<compile_context>
chip_gen: v7x
topology: tpu7x:2x2x1
jax: 0.10.0
libtpu: 0.0.40
codegen_flags: <defaults>
</compile_context>

<pallas_src>
import jax
import jax.numpy as jnp
from jax.experimental import pallas as pl
from jax.experimental.pallas import tpu as pltpu

# ----------------------------------------------------------------------------
# Module-consistent configuration (scaled-down sampling rate / segment counts).
# ----------------------------------------------------------------------------
SAMPLING_RATE = 100
FRAME_SHIFT = 0.16
SEGMENT_FRAMES = 8
OVERLAP_FRAMES = 2
WINDOW_FRAMES = 2
MAX_MUSIC_ENERGY = 0.01
MIN_SPEECH_ENERGY = 0.99
MINIMAL_ENERGY = 1e-7

FRAME_SAMPLES = int(FRAME_SHIFT * SAMPLING_RATE)          # 16
SEGMENT_SAMPLES = FRAME_SAMPLES * SEGMENT_FRAMES          # 128
OVERLAP_SAMPLES = FRAME_SAMPLES * OVERLAP_FRAMES          # 32
WINDOW_SAMPLES = FRAME_SAMPLES * WINDOW_FRAMES            # 32

NUM_SOURCES = 4
STEREO = 2
HIDDEN = 16
KSIZE = 5


# ----------------------------------------------------------------------------
# Kernel 1: masked mean / masked std per batch row (mask built from lens in SMEM).
# ----------------------------------------------------------------------------
def _stats_kernel(a_ref, lens_ref, mean_ref, std_ref):
    b = pl.program_id(0)
    a = a_ref[0]                                            # (1, Tp)
    idx = jax.lax.broadcasted_iota(jnp.int32, a.shape, 1)
    m = (idx < lens_ref[b]).astype(jnp.float32)

    cnt = jnp.maximum(jnp.sum(m, axis=-1, keepdims=True), 1.0)   # guard empty rows
    mean = jnp.sum(a * m, axis=-1, keepdims=True) / cnt
    # TODO(synk): masked_std assumed sqrt(masked_mean((x-mean)^2)) (biased, no eps).
    var = jnp.sum(((a - mean) ** 2) * m, axis=-1, keepdims=True) / cnt
    std = jnp.sqrt(var)
    std = jnp.where(std > 0.0, std, 1.0)                    # guard constant/silent rows

    mean_ref[0] = mean
    std_ref[0] = std


def masked_stats(audio_padded, lens_i32):
    B, Tp = audio_padded.shape
    a3 = audio_padded.reshape(B, 1, Tp)
    # TODO(synk): for real-scale audio, tile Tp and accumulate sum/sumsq in scratch
    # (budget against 64 MiB VMEM on v7x); one block per row is fine at these sizes.
    mean3, std3 = pl.pallas_call(
        _stats_kernel,
        out_shape=(
            jax.ShapeDtypeStruct((B, 1, 1), jnp.float32),
            jax.ShapeDtypeStruct((B, 1, 1), jnp.float32),
        ),
        grid=(B,),
        in_specs=[
            pl.BlockSpec((1, 1, Tp), lambda b: (b, 0, 0)),
            pl.BlockSpec(memory_space=pltpu.MemorySpace.SMEM),
        ],
        out_specs=(
            pl.BlockSpec((1, 1, 1), lambda b: (b, 0, 0)),
            pl.BlockSpec((1, 1, 1), lambda b: (b, 0, 0)),
        ),
        compiler_params=pltpu.CompilerParams(dimension_semantics=("parallel",)),
    )(a3, lens_i32)
    return mean3.reshape(B), std3.reshape(B)


# ----------------------------------------------------------------------------
# Kernel 2 (fused): normalize -> fade/overlap -> separation model -> window energy
# -> music/speech decision.  grid = (batch, segment); window_buffer carried in VMEM.
# ----------------------------------------------------------------------------
def _fused_segment_kernel(a_ref, fi_ref, fo_ref, w1_ref, b1_ref, w2_ref, b2_ref,
                          wp_ref, wc_ref, mean_ref, std_ref, lens_ref,
                          out_ref, win_ref):
    b = pl.program_id(0)
    s = pl.program_id(1)
    L = SEGMENT_SAMPLES
    F = FRAME_SAMPLES
    P = KSIZE // 2

    mean_b = mean_ref[b]
    std_b = std_ref[b]
    len_b = lens_ref[b]

    lane = jax.lax.broadcasted_iota(jnp.int32, (1, L), 1)
    a = a_ref[0, 0]                                          # (1, L)

    # normalize and zero masked (padded / beyond audio_lens) samples: x[~mask] = 0
    x = jnp.where((s * L + lane) < len_b, (a - mean_b) / std_b, 0.0)

    # fade-in + overlap-add of the previous fade-out buffer.  With linear fades the
    # buffer equals these same first OVERLAP samples scaled by fade_out, so no carry:
    faded = x * fi_ref[...] + x * fo_ref[...]
    xin = jnp.where(jnp.logical_and(s > 0, lane < OVERLAP_SAMPLES), faded, x)

    def shifted(arr, k):
        # arr[:, t + k - P], zero-padded at the segment edges ('same' convolution)
        sh = P - k
        if sh == 0:
            return arr
        r = pltpu.roll(arr, shift=sh % L, axis=1)
        if sh > 0:
            return jnp.where(lane >= sh, r, 0.0)
        return jnp.where(lane < L + sh, r, 0.0)

    # conv1 (stereo duplication folded into w1): 5 broadcast MACs on the VPU
    h = jnp.broadcast_to(b1_ref[...], (HIDDEN, L))
    for k in range(KSIZE):
        h = h + w1_ref[:, k:k + 1] * shifted(xin, k)
    h = jnp.maximum(h, 0.0)                                  # (HIDDEN, L)

    # conv2 + stereo-mean folded: single (4, K*HIDDEN) x (K*HIDDEN, L) MXU matmul
    him = jnp.concatenate([shifted(h, k) for k in range(KSIZE)], axis=0)  # (80, L)
    y = jnp.dot(w2_ref[...], him, preferred_element_type=jnp.float32) + b2_ref[...]
    y = y * std_b + mean_b                                   # (NUM_SOURCES, L)

    # window buffer (last frame of previous segment's y), carried across segments
    @pl.when(s == 0)
    def _():
        win_ref[...] = jnp.zeros_like(win_ref)

    wprev = win_ref[...]                                     # (NUM_SOURCES, F)
    win_ref[...] = y[:, L - F:]

    # per-window mean energy via static 0/1 window-indicator matmuls on the MXU
    e = (jnp.dot(wprev * wprev, wp_ref[...], preferred_element_type=jnp.float32)
         + jnp.dot(y * y, wc_ref[...], preferred_element_type=jnp.float32))
    e = e * (1.0 / WINDOW_SAMPLES)                           # (NUM_SOURCES, SEGMENT_FRAMES)

    music = e[0:1] + e[1:2] + e[2:3]
    speech = e[3:4]
    total = music + speech
    abs_sil = total < MINIMAL_ENERGY
    denom = jnp.where(abs_sil, 1.0, total)                   # guard 0/0
    no_music = jnp.logical_or(abs_sil, music / denom <= MAX_MUSIC_ENERGY)
    is_speech = jnp.logical_or(abs_sil, speech / denom >= MIN_SPEECH_ENERGY)
    d = jnp.logical_and(no_music, is_speech).astype(jnp.int32)   # (1, SEGMENT_FRAMES)

    # output block (1, NS, SEGMENT_FRAMES) stays resident across the segment axis;
    # each step fills its own row, block is flushed to HBM once per batch row.
    out_ref[0, pl.ds(s, 1), :] = d


def fused_segments(audio4, fi, fo, w1mat, b1, w2flat, b2eff, wp, wc, mean, std, lens):
    B, NS, _, L = audio4.shape
    return pl.pallas_call(
        _fused_segment_kernel,
        out_shape=jax.ShapeDtypeStruct((B, NS, SEGMENT_FRAMES), jnp.int32),
        grid=(B, NS),
        in_specs=[
            pl.BlockSpec((1, 1, 1, L), lambda b, s: (b, s, 0, 0)),
            pl.BlockSpec((1, L), lambda b, s: (0, 0)),
            pl.BlockSpec((1, L), lambda b, s: (0, 0)),
            pl.BlockSpec((HIDDEN, KSIZE), lambda b, s: (0, 0)),
            pl.BlockSpec((HIDDEN, 1), lambda b, s: (0, 0)),
            pl.BlockSpec((NUM_SOURCES, KSIZE * HIDDEN), lambda b, s: (0, 0)),
            pl.BlockSpec((NUM_SOURCES, 1), lambda b, s: (0, 0)),
            pl.BlockSpec((FRAME_SAMPLES, SEGMENT_FRAMES), lambda b, s: (0, 0)),
            pl.BlockSpec((SEGMENT_SAMPLES, SEGMENT_FRAMES), lambda b, s: (0, 0)),
            pl.BlockSpec(memory_space=pltpu.MemorySpace.SMEM),
            pl.BlockSpec(memory_space=pltpu.MemorySpace.SMEM),
            pl.BlockSpec(memory_space=pltpu.MemorySpace.SMEM),
        ],
        out_specs=pl.BlockSpec((1, NS, SEGMENT_FRAMES), lambda b, s: (b, 0, 0)),
        scratch_shapes=[pltpu.VMEM((NUM_SOURCES, FRAME_SAMPLES), jnp.float32)],
        compiler_params=pltpu.CompilerParams(
            dimension_semantics=("parallel", "arbitrary")),
    )(audio4, fi, fo, w1mat, b1, w2flat, b2eff, wp, wc, mean, std, lens)


# ----------------------------------------------------------------------------
# Full SourceSeparator.forward (host glue: padding, weight folding, final crop/mask).
# ----------------------------------------------------------------------------
def source_separator_forward(audio, audio_lens, params):
    B, T = audio.shape
    F = FRAME_SAMPLES

    padded_lens = (T + SEGMENT_SAMPLES - 1) // SEGMENT_SAMPLES * SEGMENT_SAMPLES
    pad_size = padded_lens - T + OVERLAP_SAMPLES
    audio_p = jnp.pad(audio, ((0, 0), (0, pad_size)))
    Tp = T + pad_size
    NS = (Tp - OVERLAP_SAMPLES) // SEGMENT_SAMPLES
    lens_i32 = audio_lens.astype(jnp.int32)

    mean, std = masked_stats(audio_p, lens_i32)              # (B,), (B,)

    # --- fold stereo duplication / stereo mean into the model weights (pure algebra)
    w1 = params["w1"]                                        # (K, HIDDEN, 2)
    w2 = params["w2"]                                        # (K, 2*NUM_SOURCES, HIDDEN)
    b2 = params["b2"]                                        # (2*NUM_SOURCES, 1)
    w1mat = jnp.transpose(w1[:, :, 0] + w1[:, :, 1])         # (HIDDEN, K)
    w2_eff = 0.5 * (w2[:, 0::2, :] + w2[:, 1::2, :])         # (K, NUM_SOURCES, HIDDEN)
    w2flat = jnp.transpose(w2_eff, (1, 0, 2)).reshape(NUM_SOURCES, KSIZE * HIDDEN)
    b2eff = 0.5 * (b2[0::2] + b2[1::2])                      # (NUM_SOURCES, 1)
    b1 = params["b1"]                                        # (HIDDEN, 1)

    # --- fade ramps (torchaudio Fade, linear), extended to segment width
    ramp = jnp.linspace(0.0, 1.0, OVERLAP_SAMPLES).astype(jnp.float32)
    fi = jnp.zeros((1, SEGMENT_SAMPLES), jnp.float32).at[0, :OVERLAP_SAMPLES].set(ramp)
    fo = jnp.zeros((1, SEGMENT_SAMPLES), jnp.float32).at[0, :OVERLAP_SAMPLES].set(1.0 - ramp)

    # --- static 0/1 window-indicator: frame j covers [prev_frame ; y][j*F : j*F+2F]
    t_idx = jnp.arange(F + SEGMENT_SAMPLES)[:, None]
    j_idx = jnp.arange(SEGMENT_FRAMES)[None, :]
    W = ((t_idx >= j_idx * F) & (t_idx < j_idx * F + WINDOW_SAMPLES)).astype(jnp.float32)
    wp, wc = W[:F], W[F:]                                    # (F, 8), (SEG, 8)

    # --- fused per-segment pipeline (2nd and last pallas_call of the forward)
    audio4 = audio_p[:, :NS * SEGMENT_SAMPLES].reshape(B, NS, 1, SEGMENT_SAMPLES)
    raw = fused_segments(audio4, fi, fo, w1mat, b1, w2flat, b2eff, wp, wc,
                         mean, std, lens_i32)                # (B, NS, 8) int32

    # frame (seg, j) maps to global frame 8*seg + j - 1; entry (0, 0) is a dummy
    flat = raw.reshape(B, NS * SEGMENT_FRAMES)[:, 1:]        # (B, 8*NS - 1)

    n_frames = (lens_i32 + 2 * F - 1 - WINDOW_SAMPLES) // F
    # TODO(synk): original crops to n_frames.max() (data-dependent host sync); we use
    # the static T-derived bound to stay jittable — extra columns are masked False.
    max_nf = min(NS * SEGMENT_FRAMES - 1, (T + 2 * F - 1 - WINDOW_SAMPLES) // F)
    out = flat[:, :max_nf].astype(bool)
    fmask = jnp.arange(max_nf)[None, :] < n_frames[:, None]
    return jnp.logical_and(out, fmask)                       # (B, L) frames without music


if __name__ == "__main__":
    key = jax.random.PRNGKey(0)
    k1, k2, k3, k4, ka = jax.random.split(key, 5)
    params = {
        "w1": jax.random.normal(k1, (KSIZE, HIDDEN, STEREO), jnp.float32) * 0.3,
        "b1": jax.random.normal(k2, (HIDDEN, 1), jnp.float32) * 0.1,
        "w2": jax.random.normal(k3, (KSIZE, NUM_SOURCES * STEREO, HIDDEN), jnp.float32) * 0.2,
        "b2": jax.random.normal(k4, (NUM_SOURCES * STEREO, 1), jnp.float32) * 0.1,
    }

    B, T = 2, 300
    audio = jax.random.normal(ka, (B, T), jnp.float32) * 0.5
    audio_lens = jnp.array([300, 220], dtype=jnp.int32)

    fwd = jax.jit(source_separator_forward)
    out = fwd(audio, audio_lens, params)
    jax.block_until_ready(out)
    assert out.shape == (B, 18) and out.dtype == jnp.bool_
    print("KERNEL_OK")
</pallas_src>

<mosaic_0001>
module attributes {stable_mosaic.version = 11 : i64} {
  func.func @_stats_kernel(%arg0: i32, %arg1: memref<1x1x416xf32, #tpu.memory_space<vmem>>, %arg2: memref<2xi32, #tpu.memory_space<smem>>, %arg3: memref<1x1x1xf32, #tpu.memory_space<vmem>>, %arg4: memref<1x1x1xf32, #tpu.memory_space<vmem>>) attributes {dimension_semantics = [#tpu.dimension_semantics<parallel>], iteration_bounds = array<i64: 2>, scalar_prefetch = 0 : i64, scratch_operands = 0 : i64, tpu.core_type = #tpu.core_type<tc>, window_params = [{transform_indices = @transform_0, window_bounds = array<i64: 1, 1, 416>}, {transform_indices = @transform_1, window_bounds = array<i64: 2>}, {transform_indices = @transform_2, window_bounds = array<i64: 1, 1, 1>}, {transform_indices = @transform_3, window_bounds = array<i64: 1, 1, 1>}]} {
    %c0 = arith.constant 0 : index
    %c0_0 = arith.constant 0 : index
    %c0_1 = arith.constant 0 : index
    %0 = vector.load %arg1[%c0, %c0_0, %c0_1] : memref<1x1x416xf32, #tpu.memory_space<vmem>>, vector<1x1x416xf32>
    %1 = vector.shape_cast %0 : vector<1x1x416xf32> to vector<1x416xf32>
    %2 = tpu.iota {dimensions = array<i32: 1>} : vector<1x416xi32>
    %3 = arith.index_cast %arg0 : i32 to index
    %4 = memref.load %arg2[%3] : memref<2xi32, #tpu.memory_space<smem>>
    %5 = vector.broadcast %4 : i32 to vector<1x416xi32>
    %6 = arith.cmpi slt, %2, %5 : vector<1x416xi32>
    %7 = arith.extui %6 : vector<1x416xi1> to vector<1x416xi32>
    %8 = arith.sitofp %7 : vector<1x416xi32> to vector<1x416xf32>
    %cst = arith.constant dense<0.000000e+00> : vector<1xf32>
    %9 = vector.multi_reduction <add>, %8, %cst [1] : vector<1x416xf32> to vector<1xf32>
    %10 = vector.shape_cast %9 : vector<1xf32> to vector<1x1xf32>
    %cst_2 = arith.constant 1.000000e+00 : f32
    %11 = vector.broadcast %cst_2 : f32 to vector<1x1xf32>
    %12 = arith.maximumf %10, %11 : vector<1x1xf32>
    %13 = arith.mulf %1, %8 : vector<1x416xf32>
    %cst_3 = arith.constant dense<0.000000e+00> : vector<1xf32>
    %14 = vector.multi_reduction <add>, %13, %cst_3 [1] : vector<1x416xf32> to vector<1xf32>
    %15 = vector.shape_cast %14 : vector<1xf32> to vector<1x1xf32>
    %16 = arith.divf %15, %12 : vector<1x1xf32>
    %17 = vector.broadcast %16 : vector<1x1xf32> to vector<1x416xf32>
    %18 = arith.subf %1, %17 : vector<1x416xf32>
    %19 = arith.mulf %18, %18 : vector<1x416xf32>
    %20 = arith.mulf %19, %8 : vector<1x416xf32>
    %cst_4 = arith.constant dense<0.000000e+00> : vector<1xf32>
    %21 = vector.multi_reduction <add>, %20, %cst_4 [1] : vector<1x416xf32> to vector<1xf32>
    %22 = vector.shape_cast %21 : vector<1xf32> to vector<1x1xf32>
    %23 = arith.divf %22, %12 : vector<1x1xf32>
    %24 = math.sqrt %23 : vector<1x1xf32>
    %cst_5 = arith.constant 0.000000e+00 : f32
    %25 = vector.broadcast %cst_5 : f32 to vector<1x1xf32>
    %26 = arith.cmpf ogt, %24, %25 : vector<1x1xf32>
    %cst_6 = arith.constant 1.000000e+00 : f32
    %27 = vector.broadcast %cst_6 : f32 to vector<1x1xf32>
    %28 = arith.select %26, %24, %27 : vector<1x1xi1>, vector<1x1xf32>
    %c0_7 = arith.constant 0 : index
    %c0_8 = arith.constant 0 : index
    %c0_9 = arith.constant 0 : index
    %29 = vector.load %arg3[%c0_7, %c0_8, %c0_9] : memref<1x1x1xf32, #tpu.memory_space<vmem>>, vector<1x1x1xf32>
    %30 = vector.shape_cast %29 : vector<1x1x1xf32> to vector<1x1xf32>
    %31 = vector.shape_cast %16 : vector<1x1xf32> to vector<1x1x1xf32>
    tpu.vector_store %arg3[%c0_7, %c0_8, %c0_9], %31 {strides = array<i32>} : memref<1x1x1xf32, #tpu.memory_space<vmem>>, vector<1x1x1xf32>,
    %c0_10 = arith.constant 0 : index
    %c0_11 = arith.constant 0 : index
    %c0_12 = arith.constant 0 : index
    %32 = vector.load %arg4[%c0_10, %c0_11, %c0_12] : memref<1x1x1xf32, #tpu.memory_space<vmem>>, vector<1x1x1xf32>
    %33 = vector.shape_cast %32 : vector<1x1x1xf32> to vector<1x1xf32>
    %34 = vector.shape_cast %28 : vector<1x1xf32> to vector<1x1x1xf32>
    tpu.vector_store %arg4[%c0_10, %c0_11, %c0_12], %34 {strides = array<i32>} : memref<1x1x1xf32, #tpu.memory_space<vmem>>, vector<1x1x1xf32>,
    return
  }
  func.func @transform_0(%arg0: i32) -> (i32, i32, i32) {
    %c0_i32 = arith.constant 0 : i32
    %c0_i32_0 = arith.constant 0 : i32
    %c0_i32_1 = arith.constant 0 : i32
    return %arg0, %c0_i32, %c0_i32_0 : i32, i32, i32
  }
  func.func @transform_1(%arg0: i32) -> i32 {
    %c0_i32 = arith.constant 0 : i32
    %c0_i32_0 = arith.constant 0 : i32
    return %c0_i32 : i32
  }
  func.func @transform_2(%arg0: i32) -> (i32, i32, i32) {
    %c0_i32 = arith.constant 0 : i32
    %c0_i32_0 = arith.constant 0 : i32
    %c0_i32_1 = arith.constant 0 : i32
    return %arg0, %c0_i32, %c0_i32_0 : i32, i32, i32
  }
  func.func @transform_3(%arg0: i32) -> (i32, i32, i32) {
    %c0_i32 = arith.constant 0 : i32
    %c0_i32_0 = arith.constant 0 : i32
    %c0_i32_1 = arith.constant 0 : i32
    return %arg0, %c0_i32, %c0_i32_0 : i32, i32, i32
  }
}

module attributes {stable_mosaic.version = 11 : i64} {
  func.func @_fused_segment_kernel(%arg0: i32, %arg1: i32, %arg2: memref<1x1x1x128xf32, #tpu.memory_space<vmem>>, %arg3: memref<1x128xf32, #tpu.memory_space<vmem>>, %arg4: memref<1x128xf32, #tpu.memory_space<vmem>>, %arg5: memref<16x5xf32, #tpu.memory_space<vmem>>, %arg6: memref<16x1xf32, #tpu.memory_space<vmem>>, %arg7: memref<4x80xf32, #tpu.memory_space<vmem>>, %arg8: memref<4x1xf32, #tpu.memory_space<vmem>>, %arg9: memref<16x8xf32, #tpu.memory_space<vmem>>, %arg10: memref<128x8xf32, #tpu.memory_space<vmem>>, %arg11: memref<2xf32, #tpu.memory_space<smem>>, %arg12: memref<2xf32, #tpu.memory_space<smem>>, %arg13: memref<2xi32, #tpu.memory_space<smem>>, %arg14: memref<1x3x8xi32, #tpu.memory_space<vmem>>, %arg15: memref<4x16xf32, #tpu.memory_space<vmem>>) attributes {dimension_semantics = [#tpu.dimension_semantics<parallel>, #tpu.dimension_semantics<arbitrary>], iteration_bounds = array<i64: 2, 3>, scalar_prefetch = 0 : i64, scratch_operands = 1 : i64, tpu.core_type = #tpu.core_type<tc>, window_params = [{transform_indices = @transform_0, window_bounds = array<i64: 1, 1, 1, 128>}, {pipeline_mode = #tpu.pipeline_mode<synchronous>, transform_indices = @transform_1, window_bounds = array<i64: 1, 128>}, {pipeline_mode = #tpu.pipeline_mode<synchronous>, transform_indices = @transform_2, window_bounds = array<i64: 1, 128>}, {pipeline_mode = #tpu.pipeline_mode<synchronous>, transform_indices = @transform_3, window_bounds = array<i64: 16, 5>}, {pipeline_mode = #tpu.pipeline_mode<synchronous>, transform_indices = @transform_4, window_bounds = array<i64: 16, 1>}, {pipeline_mode = #tpu.pipeline_mode<synchronous>, transform_indices = @transform_5, window_bounds = array<i64: 4, 80>}, {pipeline_mode = #tpu.pipeline_mode<synchronous>, transform_indices = @transform_6, window_bounds = array<i64: 4, 1>}, {pipeline_mode = #tpu.pipeline_mode<synchronous>, transform_indices = @transform_7, window_bounds = array<i64: 16, 8>}, {pipeline_mode = #tpu.pipeline_mode<synchronous>, transform_indices = @transform_8, window_bounds = array<i64: 128, 8>}, {transform_indices = @transform_9, window_bounds = array<i64: 2>}, {transform_indices = @transform_10, window_bounds = array<i64: 2>}, {transform_indices = @transform_11, window_bounds = array<i64: 2>}, {transform_indices = @transform_12, window_bounds = array<i64: 1, 3, 8>}]} {
    %0 = arith.index_cast %arg0 : i32 to index
    %1 = memref.load %arg11[%0] : memref<2xf32, #tpu.memory_space<smem>>
    %2 = arith.index_cast %arg0 : i32 to index
    %3 = memref.load %arg12[%2] : memref<2xf32, #tpu.memory_space<smem>>
    %4 = arith.index_cast %arg0 : i32 to index
    %5 = memref.load %arg13[%4] : memref<2xi32, #tpu.memory_space<smem>>
    %6 = tpu.iota {dimensions = array<i32: 1>} : vector<1x128xi32>
    %c0 = arith.constant 0 : index
    %c0_0 = arith.constant 0 : index
    %c0_1 = arith.constant 0 : index
    %c0_2 = arith.constant 0 : index
    %7 = vector.load %arg2[%c0, %c0_0, %c0_1, %c0_2] : memref<1x1x1x128xf32, #tpu.memory_space<vmem>>, vector<1x1x1x128xf32>
    %8 = vector.shape_cast %7 : vector<1x1x1x128xf32> to vector<1x128xf32>
    %c128_i32 = arith.constant 128 : i32
    %9 = arith.muli %arg1, %c128_i32 : i32
    %10 = vector.broadcast %9 : i32 to vector<1x128xi32>
    %11 = arith.addi %10, %6 : vector<1x128xi32>
    %12 = vector.broadcast %5 : i32 to vector<1x128xi32>
    %13 = arith.cmpi slt, %11, %12 : vector<1x128xi32>
    %14 = vector.broadcast %1 : f32 to vector<1x128xf32>
    %15 = arith.subf %8, %14 : vector<1x128xf32>
    %16 = vector.broadcast %3 : f32 to vector<1x128xf32>
    %17 = arith.divf %15, %16 : vector<1x128xf32>
    %cst = arith.constant 0.000000e+00 : f32
    %18 = vector.broadcast %cst : f32 to vector<1x128xf32>
    %19 = arith.select %13, %17, %18 : vector<1x128xi1>, vector<1x128xf32>
    %c0_3 = arith.constant 0 : index
    %c0_4 = arith.constant 0 : index
    %20 = vector.load %arg3[%c0_3, %c0_4] : memref<1x128xf32, #tpu.memory_space<vmem>>, vector<1x128xf32>
    %21 = arith.mulf %19, %20 : vector<1x128xf32>
    %c0_5 = arith.constant 0 : index
    %c0_6 = arith.constant 0 : index
    %22 = vector.load %arg4[%c0_5, %c0_6] : memref<1x128xf32, #tpu.memory_space<vmem>>, vector<1x128xf32>
    %23 = arith.mulf %19, %22 : vector<1x128xf32>
    %24 = arith.addf %21, %23 : vector<1x128xf32>
    %c0_i32 = arith.constant 0 : i32
    %25 = arith.cmpi sgt, %arg1, %c0_i32 : i32
    %c32_i32 = arith.constant 32 : i32
    %26 = vector.broadcast %c32_i32 : i32 to vector<1x128xi32>
    %27 = arith.cmpi slt, %6, %26 : vector<1x128xi32>
    %28 = vector.broadcast %25 : i1 to vector<1x128xi1>
    %29 = arith.andi %28, %27 : vector<1x128xi1>
    %30 = arith.select %29, %24, %19 : vector<1x128xi1>, vector<1x128xf32>
    %c0_7 = arith.constant 0 : index
    %c0_8 = arith.constant 0 : index
    %31 = vector.load %arg6[%c0_7, %c0_8] : memref<16x1xf32, #tpu.memory_space<vmem>>, vector<16x1xf32>
    %32 = vector.shape_cast %31 : vector<16x1xf32> to vector<16x1xf32>
    %33 = vector.broadcast %32 : vector<16x1xf32> to vector<16x128xf32>
    %c0_9 = arith.constant 0 : index
    %c0_10 = arith.constant 0 : index
    %34 = vector.load %arg5[%c0_9, %c0_10] : memref<16x5xf32, #tpu.memory_space<vmem>>, vector<16x1xf32>
    %c2_i32 = arith.constant 2 : i32
    %35 = tpu.dynamic_rotate %30 by %c2_i32 dim 1 : vector<1x128xf32>, i32 -> vector<1x128xf32>
    %c2_i32_11 = arith.constant 2 : i32
    %36 = vector.broadcast %c2_i32_11 : i32 to vector<1x128xi32>
    %37 = arith.cmpi sge, %6, %36 : vector<1x128xi32>
    %cst_12 = arith.constant 0.000000e+00 : f32
    %38 = vector.broadcast %cst_12 : f32 to vector<1x128xf32>
    %39 = arith.select %37, %35, %38 : vector<1x128xi1>, vector<1x128xf32>
    %40 = vector.broadcast %34 : vector<16x1xf32> to vector<16x128xf32>
    %41 = vector.broadcast %39 : vector<1x128xf32> to vector<16x128xf32>
    %42 = arith.mulf %40, %41 : vector<16x128xf32>
    %43 = arith.addf %33, %42 : vector<16x128xf32>
    %c0_13 = arith.constant 0 : index
    %c1 = arith.constant 1 : index
    %44 = vector.load %arg5[%c0_13, %c1] : memref<16x5xf32, #tpu.memory_space<vmem>>, vector<16x1xf32>
    %c1_i32 = arith.constant 1 : i32
    %45 = tpu.dynamic_rotate %30 by %c1_i32 dim 1 : vector<1x128xf32>, i32 -> vector<1x128xf32>
    %c1_i32_14 = arith.constant 1 : i32
    %46 = vector.broadcast %c1_i32_14 : i32 to vector<1x128xi32>
    %47 = arith.cmpi sge, %6, %46 : vector<1x128xi32>
    %cst_15 = arith.constant 0.000000e+00 : f32
    %48 = vector.broadcast %cst_15 : f32 to vector<1x128xf32>
    %49 = arith.select %47, %45, %48 : vector<1x128xi1>, vector<1x128xf32>
    %50 = vector.broadcast %44 : vector<16x1xf32> to vector<16x128xf32>
    %51 = vector.broadcast %49 : vector<1x128xf32> to vector<16x128xf32>
    %52 = arith.mulf %50, %51 : vector<16x128xf32>
    %53 = arith.addf %43, %52 : vector<16x128xf32>
    %c0_16 = arith.constant 0 : index
    %c2 = arith.constant 2 : index
    %54 = vector.load %arg5[%c0_16, %c2] : memref<16x5xf32, #tpu.memory_space<vmem>>, vector<16x1xf32>
    %55 = vector.broadcast %54 : vector<16x1xf32> to vector<16x128xf32>
    %56 = vector.broadcast %30 : vector<1x128xf32> to vector<16x128xf32>
    %57 = arith.mulf %55, %56 : vector<16x128xf32>
    %58 = arith.addf %53, %57 : vector<16x128xf32>
    %c0_17 = arith.constant 0 : index
    %c3 = arith.constant 3 : index
    %59 = vector.load %arg5[%c0_17, %c3] : memref<16x5xf32, #tpu.memory_space<vmem>>, vector<16x1xf32>
    %c127_i32 = arith.constant 127 : i32
    %60 = tpu.dynamic_rotate %30 by %c127_i32 dim 1 : vector<1x128xf32>, i32 -> vector<1x128xf32>
    %c127_i32_18 = arith.constant 127 : i32
    %61 = vector.broadcast %c127_i32_18 : i32 to vector<1x128xi32>
    %62 = arith.cmpi slt, %6, %61 : vector<1x128xi32>
    %cst_19 = arith.constant 0.000000e+00 : f32
    %63 = vector.broadcast %cst_19 : f32 to vector<1x128xf32>
    %64 = arith.select %62, %60, %63 : vector<1x128xi1>, vector<1x128xf32>
    %65 = vector.broadcast %59 : vector<16x1xf32> to vector<16x128xf32>
    %66 = vector.broadcast %64 : vector<1x128xf32> to vector<16x128xf32>
    %67 = arith.mulf %65, %66 : vector<16x128xf32>
    %68 = arith.addf %58, %67 : vector<16x128xf32>
    %c0_20 = arith.constant 0 : index
    %c4 = arith.constant 4 : index
    %69 = vector.load %arg5[%c0_20, %c4] : memref<16x5xf32, #tpu.memory_space<vmem>>, vector<16x1xf32>
    %c126_i32 = arith.constant 126 : i32
    %70 = tpu.dynamic_rotate %30 by %c126_i32 dim 1 : vector<1x128xf32>, i32 -> vector<1x128xf32>
    %c126_i32_21 = arith.constant 126 : i32
    %71 = vector.broadcast %c126_i32_21 : i32 to vector<1x128xi32>
    %72 = arith.cmpi slt, %6, %71 : vector<1x128xi32>
    %cst_22 = arith.constant 0.000000e+00 : f32
    %73 = vector.broadcast %cst_22 : f32 to vector<1x128xf32>
    %74 = arith.select %72, %70, %73 : vector<1x128xi1>, vector<1x128xf32>
    %75 = vector.broadcast %69 : vector<16x1xf32> to vector<16x128xf32>
    %76 = vector.broadcast %74 : vector<1x128xf32> to vector<16x128xf32>
    %77 = arith.mulf %75, %76 : vector<16x128xf32>
    %78 = arith.addf %68, %77 : vector<16x128xf32>
    %cst_23 = arith.constant 0.000000e+00 : f32
    %79 = vector.broadcast %cst_23 : f32 to vector<16x128xf32>
    %80 = arith.maximumf %78, %79 : vector<16x128xf32>
    %c2_i32_24 = arith.constant 2 : i32
    %81 = tpu.dynamic_rotate %80 by %c2_i32_24 dim 1 : vector<16x128xf32>, i32 -> vector<16x128xf32>
    %c2_i32_25 = arith.constant 2 : i32
    %82 = vector.broadcast %c2_i32_25 : i32 to vector<1x128xi32>
    %83 = arith.cmpi sge, %6, %82 : vector<1x128xi32>
    %cst_26 = arith.constant 0.000000e+00 : f32
    %84 = vector.shape_cast %83 : vector<1x128xi1> to vector<1x128xi1>
    %85 = vector.broadcast %84 : vector<1x128xi1> to vector<16x128xi1>
    %86 = vector.broadcast %cst_26 : f32 to vector<16x128xf32>
    %87 = arith.select %85, %81, %86 : vector<16x128xi1>, vector<16x128xf32>
    %c1_i32_27 = arith.constant 1 : i32
    %88 = tpu.dynamic_rotate %80 by %c1_i32_27 dim 1 : vector<16x128xf32>, i32 -> vector<16x128xf32>
    %c1_i32_28 = arith.constant 1 : i32
    %89 = vector.broadcast %c1_i32_28 : i32 to vector<1x128xi32>
    %90 = arith.cmpi sge, %6, %89 : vector<1x128xi32>
    %cst_29 = arith.constant 0.000000e+00 : f32
    %91 = vector.shape_cast %90 : vector<1x128xi1> to vector<1x128xi1>
    %92 = vector.broadcast %91 : vector<1x128xi1> to vector<16x128xi1>
    %93 = vector.broadcast %cst_29 : f32 to vector<16x128xf32>
    %94 = arith.select %92, %88, %93 : vector<16x128xi1>, vector<16x128xf32>
    %c127_i32_30 = arith.constant 127 : i32
    %95 = tpu.dynamic_rotate %80 by %c127_i32_30 dim 1 : vector<16x128xf32>, i32 -> vector<16x128xf32>
    %c127_i32_31 = arith.constant 127 : i32
    %96 = vector.broadcast %c127_i32_31 : i32 to vector<1x128xi32>
    %97 = arith.cmpi slt, %6, %96 : vector<1x128xi32>
    %cst_32 = arith.constant 0.000000e+00 : f32
    %98 = vector.shape_cast %97 : vector<1x128xi1> to vector<1x128xi1>
    %99 = vector.broadcast %98 : vector<1x128xi1> to vector<16x128xi1>
    %100 = vector.broadcast %cst_32 : f32 to vector<16x128xf32>
    %101 = arith.select %99, %95, %100 : vector<16x128xi1>, vector<16x128xf32>
    %c126_i32_33 = arith.constant 126 : i32
    %102 = tpu.dynamic_rotate %80 by %c126_i32_33 dim 1 : vector<16x128xf32>, i32 -> vector<16x128xf32>
    %c126_i32_34 = arith.constant 126 : i32
    %103 = vector.broadcast %c126_i32_34 : i32 to vector<1x128xi32>
    %104 = arith.cmpi slt, %6, %103 : vector<1x128xi32>
    %cst_35 = arith.constant 0.000000e+00 : f32
    %105 = vector.shape_cast %104 : vector<1x128xi1> to vector<1x128xi1>
    %106 = vector.broadcast %105 : vector<1x128xi1> to vector<16x128xi1>
    %107 = vector.broadcast %cst_35 : f32 to vector<16x128xf32>
    %108 = arith.select %106, %102, %107 : vector<16x128xi1>, vector<16x128xf32>
    %109 = tpu.concatenate %87, %94, %80, %101, %108 in 0 : vector<16x128xf32>, vector<16x128xf32>, vector<16x128xf32>, vector<16x128xf32>, vector<16x128xf32> -> vector<80x128xf32>
    %c0_36 = arith.constant 0 : index
    %c0_37 = arith.constant 0 : index
    %110 = vector.load %arg7[%c0_36, %c0_37] : memref<4x80xf32, #tpu.memory_space<vmem>>, vector<4x80xf32>
    %cst_38 = arith.constant dense<0.000000e+00> : vector<4x128xf32>
    %111 = tpu.matmul %110, %109, %cst_38 {dimension_numbers = #tpu.dot_dimension_numbers<[1], [0], [0], [1], [0, 0, 1, 1], [], []>} : vector<4x80xf32>, vector<80x128xf32>, vector<4x128xf32> -> vector<4x128xf32>
    %c0_39 = arith.constant 0 : index
    %c0_40 = arith.constant 0 : index
    %112 = vector.load %arg8[%c0_39, %c0_40] : memref<4x1xf32, #tpu.memory_space<vmem>>, vector<4x1xf32>
    %113 = vector.broadcast %112 : vector<4x1xf32> to vector<4x128xf32>
    %114 = arith.addf %111, %113 : vector<4x128xf32>
    %115 = vector.broadcast %3 : f32 to vector<4x128xf32>
    %116 = arith.mulf %114, %115 : vector<4x128xf32>
    %117 = vector.broadcast %1 : f32 to vector<4x128xf32>
    %118 = arith.addf %116, %117 : vector<4x128xf32>
    %c0_i32_41 = arith.constant 0 : i32
    %119 = arith.cmpi eq, %arg1, %c0_i32_41 : i32
    %120 = arith.extui %119 : i1 to i32
    %c0_i32_42 = arith.constant 0 : i32
    %121 = arith.cmpi ne, %120, %c0_i32_42 : i32
    scf.if %121 {
      %cst_60 = arith.constant 0.000000e+00 : f32
      %159 = vector.broadcast %cst_60 : f32 to vector<4x16xf32>
      %c0_61 = arith.constant 0 : index
      %c0_62 = arith.constant 0 : index
      %160 = vector.load %arg15[%c0_61, %c0_62] : memref<4x16xf32, #tpu.memory_space<vmem>>, vector<4x16xf32>
      tpu.vector_store %arg15[%c0_61, %c0_62], %159 {strides = array<i32>} : memref<4x16xf32, #tpu.memory_space<vmem>>, vector<4x16xf32>,
    } else {
    }
    %c0_43 = arith.constant 0 : index
    %c0_44 = arith.constant 0 : index
    %122 = vector.load %arg15[%c0_43, %c0_44] : memref<4x16xf32, #tpu.memory_space<vmem>>, vector<4x16xf32>
    %123 = vector.extract_strided_slice %118 {offsets = [0, 112], sizes = [4, 16], strides = [1, 1]} : vector<4x128xf32> to vector<4x16xf32>
    %c0_45 = arith.constant 0 : index
    %c0_46 = arith.constant 0 : index
    %124 = vector.load %arg15[%c0_45, %c0_46] : memref<4x16xf32, #tpu.memory_space<vmem>>, vector<4x16xf32>
    tpu.vector_store %arg15[%c0_45, %c0_46], %123 {strides = array<i32>} : memref<4x16xf32, #tpu.memory_space<vmem>>, vector<4x16xf32>,
    %125 = arith.mulf %122, %122 : vector<4x16xf32>
    %c0_47 = arith.constant 0 : index
    %c0_48 = arith.constant 0 : index
    %126 = vector.load %arg9[%c0_47, %c0_48] : memref<16x8xf32, #tpu.memory_space<vmem>>, vector<16x8xf32>
    %cst_49 = arith.constant dense<0.000000e+00> : vector<4x8xf32>
    %127 = tpu.matmul %125, %126, %cst_49 {dimension_numbers = #tpu.dot_dimension_numbers<[1], [0], [0], [1], [0, 0, 1, 1], [], []>} : vector<4x16xf32>, vector<16x8xf32>, vector<4x8xf32> -> vector<4x8xf32>
    %128 = arith.mulf %118, %118 : vector<4x128xf32>
    %c0_50 = arith.constant 0 : index
    %c0_51 = arith.constant 0 : index
    %129 = vector.load %arg10[%c0_50, %c0_51] : memref<128x8xf32, #tpu.memory_space<vmem>>, vector<128x8xf32>
    %cst_52 = arith.constant dense<0.000000e+00> : vector<4x8xf32>
    %130 = tpu.matmul %128, %129, %cst_52 {dimension_numbers = #tpu.dot_dimension_numbers<[1], [0], [0], [1], [0, 0, 1, 1], [], []>} : vector<4x128xf32>, vector<128x8xf32>, vector<4x8xf32> -> vector<4x8xf32>
    %131 = arith.addf %127, %130 : vector<4x8xf32>
    %cst_53 = arith.constant 3.125000e-02 : f32
    %132 = vector.broadcast %cst_53 : f32 to vector<4x8xf32>
    %133 = arith.mulf %131, %132 : vector<4x8xf32>
    %134 = vector.extract_strided_slice %133 {offsets = [0, 0], sizes = [1, 8], strides = [1, 1]} : vector<4x8xf32> to vector<1x8xf32>
    %135 = vector.extract_strided_slice %133 {offsets = [1, 0], sizes = [1, 8], strides = [1, 1]} : vector<4x8xf32> to vector<1x8xf32>
    %136 = arith.addf %134, %135 : vector<1x8xf32>
    %137 = vector.extract_strided_slice %133 {offsets = [2, 0], sizes = [1, 8], strides = [1, 1]} : vector<4x8xf32> to vector<1x8xf32>
    %138 = arith.addf %136, %137 : vector<1x8xf32>
    %139 = vector.extract_strided_slice %133 {offsets = [3, 0], sizes = [1, 8], strides = [1, 1]} : vector<4x8xf32> to vector<1x8xf32>
    %140 = arith.addf %138, %139 : vector<1x8xf32>
    %cst_54 = arith.constant 1.000000e-07 : f32
    %141 = vector.broadcast %cst_54 : f32 to vector<1x8xf32>
    %142 = arith.cmpf olt, %140, %141 : vector<1x8xf32>
    %cst_55 = arith.constant 1.000000e+00 : f32
    %143 = vector.broadcast %cst_55 : f32 to vector<1x8xf32>
    %144 = arith.select %142, %143, %140 : vector<1x8xi1>, vector<1x8xf32>
    %145 = arith.divf %138, %144 : vector<1x8xf32>
    %cst_56 = arith.constant 0.00999999977 : f32
    %146 = vector.broadcast %cst_56 : f32 to vector<1x8xf32>
    %147 = arith.cmpf ole, %145, %146 : vector<1x8xf32>
    %148 = arith.ori %142, %147 : vector<1x8xi1>
    %149 = arith.divf %139, %144 : vector<1x8xf32>
    %cst_57 = arith.constant 9.900000e-01 : f32
    %150 = vector.broadcast %cst_57 : f32 to vector<1x8xf32>
    %151 = arith.cmpf oge, %149, %150 : vector<1x8xf32>
    %152 = arith.ori %142, %151 : vector<1x8xi1>
    %153 = arith.andi %148, %152 : vector<1x8xi1>
    %154 = arith.extui %153 : vector<1x8xi1> to vector<1x8xi32>
    %c0_58 = arith.constant 0 : index
    %155 = arith.index_cast %arg1 : i32 to index
    %c0_59 = arith.constant 0 : index
    %156 = vector.load %arg14[%c0_58, %155, %c0_59] : memref<1x3x8xi32, #tpu.memory_space<vmem>>, vector<1x1x8xi32>
    %157 = vector.shape_cast %156 : vector<1x1x8xi32> to vector<1x8xi32>
    %158 = vector.shape_cast %154 : vector<1x8xi32> to vector<1x1x8xi32>
    tpu.vector_store %arg14[%c0_58, %155, %c0_59], %158 {strides = array<i32>} : memref<1x3x8xi32, #tpu.memory_space<vmem>>, vector<1x1x8xi32>,
    return
  }
  func.func @transform_0(%arg0: i32, %arg1: i32) -> (i32, i32, i32, i32) {
    %c0_i32 = arith.constant 0 : i32
    %c0_i32_0 = arith.constant 0 : i32
    %c0_i32_1 = arith.constant 0 : i32
    return %arg0, %arg1, %c0_i32, %c0_i32_0 : i32, i32, i32, i32
  }
  func.func @transform_1(%arg0: i32, %arg1: i32) -> (i32, i32) {
    %c0_i32 = arith.constant 0 : i32
    %c0_i32_0 = arith.constant 0 : i32
    %c0_i32_1 = arith.constant 0 : i32
    return %c0_i32, %c0_i32_0 : i32, i32
  }
  func.func @transform_2(%arg0: i32, %arg1: i32) -> (i32, i32) {
    %c0_i32 = arith.constant 0 : i32
    %c0_i32_0 = arith.constant 0 : i32
    %c0_i32_1 = arith.constant 0 : i32
    return %c0_i32, %c0_i32_0 : i32, i32
  }
  func.func @transform_3(%arg0: i32, %arg1: i32) -> (i32, i32) {
    %c0_i32 = arith.constant 0 : i32
    %c0_i32_0 = arith.constant 0 : i32
    %c0_i32_1 = arith.constant 0 : i32
    return %c0_i32, %c0_i32_0 : i32, i32
  }
  func.func @transform_4(%arg0: i32, %arg1: i32) -> (i32, i32) {
    %c0_i32 = arith.constant 0 : i32
    %c0_i32_0 = arith.constant 0 : i32
    %c0_i32_1 = arith.constant 0 : i32
    return %c0_i32, %c0_i32_0 : i32, i32
  }
  func.func @transform_5(%arg0: i32, %arg1: i32) -> (i32, i32) {
    %c0_i32 = arith.constant 0 : i32
    %c0_i32_0 = arith.constant 0 : i32
    %c0_i32_1 = arith.constant 0 : i32
    return %c0_i32, %c0_i32_0 : i32, i32
  }
  func.func @transform_6(%arg0: i32, %arg1: i32) -> (i32, i32) {
    %c0_i32 = arith.constant 0 : i32
    %c0_i32_0 = arith.constant 0 : i32
    %c0_i32_1 = arith.constant 0 : i32
    return %c0_i32, %c0_i32_0 : i32, i32
  }
  func.func @transform_7(%arg0: i32, %arg1: i32) -> (i32, i32) {
    %c0_i32 = arith.constant 0 : i32
    %c0_i32_0 = arith.constant 0 : i32
    %c0_i32_1 = arith.constant 0 : i32
    return %c0_i32, %c0_i32_0 : i32, i32
  }
  func.func @transform_8(%arg0: i32, %arg1: i32) -> (i32, i32) {
    %c0_i32 = arith.constant 0 : i32
    %c0_i32_0 = arith.constant 0 : i32
    %c0_i32_1 = arith.constant 0 : i32
    return %c0_i32, %c0_i32_0 : i32, i32
  }
  func.func @transform_9(%arg0: i32, %arg1: i32) -> i32 {
    %c0_i32 = arith.constant 0 : i32
    %c0_i32_0 = arith.constant 0 : i32
    return %c0_i32 : i32
  }
  func.func @transform_10(%arg0: i32, %arg1: i32) -> i32 {
    %c0_i32 = arith.constant 0 : i32
    %c0_i32_0 = arith.constant 0 : i32
    return %c0_i32 : i32
  }
  func.func @transform_11(%arg0: i32, %arg1: i32) -> i32 {
    %c0_i32 = arith.constant 0 : i32
    %c0_i32_0 = arith.constant 0 : i32
    return %c0_i32 : i32
  }
  func.func @transform_12(%arg0: i32, %arg1: i32) -> (i32, i32, i32) {
    %c0_i32 = arith.constant 0 : i32
    %c0_i32_0 = arith.constant 0 : i32
    %c0_i32_1 = arith.constant 0 : i32
    return %arg0, %c0_i32, %c0_i32_0 : i32, i32, i32
  }
}

</mosaic_0001>

<bundles_post_ra>
// kernel: source_separator_forward.2
= control target key start
LH: loop header
LB: loop body
LE: loop exit
PB: predicated region body
PF: predicated region fallthrough
CT: control target
= control target key end

     0   :  { %9 = vsyncpa [#allocation3], 0  ;;  %s504_s12 = smov 0   ;;  %s569_s0 = inlined_call_operand.vmem [shape: f32[2,1,416], index: 0, kind: input, shape index: {}]   ;;  %s570_s1 = inlined_call_operand.vmem [shape: s32[2], index: 1, kind: input, shape index: {}]   ;;  %s571_s2 = inlined_call_operand.vmem [shape: f32[2,1,1], index: 2, kind: output, shape index: {0}]   ;;  %s572_s3 = inlined_call_operand.vmem [shape: f32[2,1,1], index: 3, kind: output, shape index: {1}]  }
   0x1 LB: > { %s510_s13 = sadd.s32 4294967295, %s479_s12   ;;  %p417_p0 = scmp.ge.s32.totalorder %s479_s12, 1  ;;  %s479_s12 = sphi %s504_s12, %s15_s12  }
   0x2   : > { %p119_p1 = scmp.lt.s32.totalorder %s479_s12, 3  ;;  %s132_s16 = sshll.u32 %s570_s1, 4  ;;  %s133_s16 = int_to_ptr.vmem [resolvable:$true] %s132_s16 }
   0x3   : > { %p437_p3 = scmp.eq.s32.totalorder %s510_s13, 0  ;;  %s454_s18 = scalar_lea.vmem %s133_s16, 16 }
   0x4   : > { %p517_p2 = pnand %p417_p0, %p119_p1  ;;  %p455_p6 = scmp.ne.s32.totalorder %s133_s16, %s454_s18 }
   0x5   : > { %p462_p10 = scmp.lt.s32.totalorder %s133_s16, %s133_s16  ;;  %p463_p11 = scmp.lt.s32.totalorder %s454_s18, %s454_s18 }
   0x6   : > { %p433_p4 = pneg %p517_p2 }
   0x7   : > { %p464_p12 = por %p463_p11, %p462_p10 }
   0x8   : > { %p434_p5 = pnand %p437_p3, %p433_p4 }
   0xa   : > { %p456_p7 = pneg %p434_p5 }
   0xc   : > { %p457_p8 = pnand %p456_p7, %p455_p6 }
   0xe   : > { %p458_p9 = pneg %p457_p8 }
  0x10   : > { %p465_p13 = pnand %p464_p12, %p458_p9 }
  0x12   : > { %468 = shalt.err (!%p465_p13)
}
  0x13   : > { %s481_s19 = smov [#allocation2]   ;;  %152 = sbr.rel (%p517_p2) target bundleno = 380 (0x17c), region = 28 }
  0x14   : > { %436 = dma.vmem_to_smem (!%p434_p5), %s133_s16, 16, %s481_s19, [#allocation3]  }
  0x1a   : > { %474 = dma.done.wait (%p437_p3), [#allocation3], 16  }
  0x1b   : > { %476 = vsyncadd (%p437_p3), [#allocation3], 4294967280 }
  0x1c   : > { %158 = sfence }
  0x1d   : > { %v188_v0 = vlaneseq  ;;  %s193_s20 = sld [smem:[#allocation2 + %s510_s13]]  ;;  %p177_p0 = scmp.lt.s32.totalorder %s510_s13, 1  ;;  %v482_v1 = vmov 1966171168   ;;  %vm209_vm0 = vcmask 261120   ;;  %v483_v11 = vmov 0.0  }
  0x1e   : > { %v222_v2 = vunpack.c.l.s4 %v482_v1  ;;  %vm266_vm5 = vcmask 1040384   ;;  %vm272_vm6 = vcmask 253952   ;;  %vm328_vm7 = vcmask 0  }
  0x1f   : > { %v189_v3 = vand.u32 127, %v188_v0  ;;  %v534_v4 = vshrl.u32 %v188_v0, 7  ;;  %s575_s13 = smov (!%p177_p0, %s510_s13), 1 }
  0x20   : > { %v223_v5 = vunpack.c.0.s8 %v222_v2  ;;  %s422_s21 = sshll.u32 %s575_s13, 2  ;;  %s183_s27 = scalar_lea.vmem %s571_s2, %s575_s13 }
  0x21   : > { %v190_v6 = vadd.s32 128, %v189_v3  ;;  %v191_v7 = vadd.s32 256, %v189_v3  ;;  %v192_v8 = vadd.s32 384, %v189_v3  ;;  %s180_s24 = scalar_lea.vmem %s569_s0, %s422_s21  ;;  %v248_v26 = vsub.s32 0, %v534_v4  ;;  %s186_s30 = scalar_lea.vmem %s572_s3, %s575_s13 }
  0x22   : > { %v226_v10 = vsub.s32 %v223_v5, %v534_v4  ;;  %v187_v25 = vld [vmem:[%s180_s24] sm:$0xf]  ;;  %v252_v28 = vsub.s32 1, %v534_v4  ;;  %v256_v29 = vsub.s32 2, %v534_v4  ;;  %v260_v30 = vsub.s32 3, %v534_v4 }
  0x23   : > { %v194_v9 = vstv %s193_s20 }
  0x24   : > { %vm195_vm1 = vcmp.lt.s32.totalorder %v189_v3, %v194_v9  ;;  %vm196_vm2 = vcmp.lt.s32.totalorder %v190_v6, %v194_v9  ;;  %vm197_vm3 = vcmp.lt.s32.totalorder %v191_v7, %v194_v9  ;;  %vm198_vm4 = vcmp.lt.s32.totalorder %v192_v8, %v194_v9 }
  0x25   : > { %v423_v12 = vsel %vm195_vm1, 1.0, %v483_v11  ;;  %v424_v13 = vsel %vm196_vm2, 1.0, %v483_v11  ;;  %v425_v14 = vsel %vm197_vm3, 1.0, %v483_v11  ;;  %v426_v15 = vsel %vm198_vm4, 1.0, %v483_v11 }
  0x26   : > { %v207_v16 = vadd.f32 %v424_v13, %v423_v12  ;;  %v219_v17 = vcombine.low %v423_v12, %v424_v13  ;;  %v220_v18 = vcombine.low %v425_v14, %v426_v15  ;;  %v210_v19 = vsel %vm209_vm0, %v426_v15, 0.0 }
  0x28   : > { %v208_v20 = vadd.f32 %v425_v14, %v207_v16  ;;  %v227_v21 = vrot.slane %v219_v17, %v226_v10  ;;  %v234_v22 = vrot.slane %v220_v18, %v226_v10 }
  0x2a   : > { %v211_v23 = vadd.f32 %v210_v19, %v208_v20  ;;  %v235_v24 = vcombine.low %v227_v21, %v234_v22 }
  0x2c   : > { %v242_v27 = vrot.slane %v235_v24, %v226_v10  ;;  %212 = vadd.xlane.f32.xlu0 %v211_v23 }
  0x2e   : > { %v244_v31 = vmul.f32 %v242_v27, %v187_v25 }
  0x30   : > { %v249_v32 = vrot.slane %v244_v31, %v248_v26  ;;  %v253_v33 = vrot.slane %v244_v31, %v252_v28  ;;  %v257_v34 = vrot.slane %v244_v31, %v256_v29  ;;  %v261_v35 = vrot.slane %v244_v31, %v260_v30 }
  0x32   : > { %v267_v36 = vsel %vm266_vm5, %v249_v32, 0.0  ;;  %v268_v37 = vsel %vm266_vm5, %v253_v33, 0.0  ;;  %v270_v38 = vsel %vm266_vm5, %v257_v34, 0.0  ;;  %v273_v40 = vsel %vm272_vm6, %v261_v35, 0.0 }
  0x33   : > { %v269_v39 = vadd.f32 %v268_v37, %v267_v36 }
  0x35   : > { %v271_v41 = vadd.f32 %v270_v38, %v269_v39 }
  0x37   : > { %v274_v42 = vadd.f32 %v273_v40, %v271_v41 }
  0x39   : > { %275 = vadd.xlane.f32.xlu0 %v274_v42 }
  0xb9   : > { %v213_v43 = vpop.xlane.xlu0 %212 }
  0xba   : > { %v214_v44 = vmax.f32 %v213_v43, 1.0 }
  0xbc   : > { %450 = vrcp.f32 %v214_v44 }
  0xc6   : > { %v451_v45 = vpop.eup %450  ;;  %v276_v46 = vpop.xlane.xlu0 %275 }
  0xc7   : > { %v278_v47 = vmul.f32 %v451_v45, %v276_v46 }
  0xc9   : > { %v283_v48 = vrot.slane %v278_v47, %v248_v26  ;;  %329 = vst.msk [vmem:[%s183_s27] sm:$0x1] %vm328_vm7, %v278_v47 }
  0xcb   : > { %v285_v49 = vsub.f32 %v187_v25, %v283_v48 }
  0xcd   : > { %v286_v50 = vmul.f32 %v285_v49, %v285_v49 }
  0xcf   : > { %v287_v51 = vmul.f32 %v286_v50, %v242_v27 }
  0xd1   : > { %v292_v52 = vrot.slane %v287_v51, %v248_v26  ;;  %v296_v53 = vrot.slane %v287_v51, %v252_v28  ;;  %v300_v54 = vrot.slane %v287_v51, %v256_v29  ;;  %v304_v55 = vrot.slane %v287_v51, %v260_v30 }
  0xd3   : > { %v309_v56 = vsel %vm266_vm5, %v292_v52, 0.0  ;;  %v310_v57 = vsel %vm266_vm5, %v296_v53, 0.0  ;;  %v312_v59 = vsel %vm266_vm5, %v300_v54, 0.0  ;;  %v314_v61 = vsel %vm272_vm6, %v304_v55, 0.0 }
  0xd4   : > { %v311_v58 = vadd.f32 %v310_v57, %v309_v56 }
  0xd6   : > { %v313_v60 = vadd.f32 %v312_v59, %v311_v58 }
  0xd8   : > { %v315_v62 = vadd.f32 %v314_v61, %v313_v60 }
  0xda   : > { %316 = vadd.xlane.f32.xlu1 %v315_v62 }
 0x167   : > { %v317_v63 = vpop.xlane.xlu1 %316 }
 0x168   : > { %v318_v0 = vmul.f32 %v451_v45, %v317_v63 }
 0x16a   : > { %452 = vrsqrt.f32 %v318_v0  ;;  %vm321_vm8 = vcmp.eq.f32.partialorder %v318_v0, inf  ;;  %v324_v3 = vand.u32 2147483648, %v318_v0  ;;  %vm323_vm9 = vcmp.eq.f32.partialorder %v318_v0, 0.0 }
 0x174   : > { %v453_v1 = vpop.eup %452 }
 0x175   : > { %v320_v2 = vmul.f32 %v453_v1, %v318_v0 }
 0x177   : > { %v322_v4 = vsel %vm321_vm8, %v318_v0, %v320_v2 }
 0x178   : > { %v325_v5 = vsel %vm323_vm9, %v324_v3, %v322_v4 }
 0x179   : > { %vm326_vm10 = vcmp.gt.f32.partialorder %v325_v5, 0.0 }
 0x17a   : > { %v327_v6 = vsel %vm326_vm10, %v325_v5, 1.0 }
 0x17b   : > { %330 = vst.msk [vmem:[%s186_s30] sm:$0x1] %vm328_vm7, %v327_v6 }
 0x17c PF: > { %s15_s12 = sadd.s32 1, %s479_s12  }
 0x17d   : > { %p12_p1 = scmp.ge.s32.totalorder %s15_s12, 4  }
 0x17f   :  { %14 = sbr.rel (!%p12_p1) target bundleno = 1 (0x1), region = 75 }
 0x186   :  { %360 = vsyncpa [#allocation3], 1 }
 0x187   :  { %362 = vsyncpa [#allocation3 + $0x1], 1 }

// kernel: source_separator_forward.3
= control target key start
LH: loop header
LB: loop body
LE: loop exit
PB: predicated region body
PF: predicated region fallthrough
CT: control target
= control target key end

     0   :  { %s1795_s0 = inlined_call_operand.vmem [shape: f32[2,3,1,128], index: 0, kind: input, shape index: {}]   ;;  %s1796_s1 = inlined_call_operand.vmem [shape: f32[1,128], index: 1, kind: input, shape index: {}]   ;;  %s1797_s2 = inlined_call_operand.vmem [shape: f32[1,128], index: 2, kind: input, shape index: {}]   ;;  %s1798_s3 = inlined_call_operand.vmem [shape: f32[16,5], index: 3, kind: input, shape index: {}]   ;;  %s1799_s4 = inlined_call_operand.vmem [shape: f32[16,1], index: 4, kind: input, shape index: {}]   ;;  %s1800_s5 = inlined_call_operand.vmem [shape: f32[4,80], index: 5, kind: input, shape index: {}]   ;;  %s1801_s6 = inlined_call_operand.vmem [shape: f32[4,1], index: 6, kind: input, shape index: {}]   ;;  %s1802_s7 = inlined_call_operand.vmem [shape: f32[16,8], index: 7, kind: input, shape index: {}]   ;;  %s1803_s8 = inlined_call_operand.vmem [shape: f32[128,8], index: 8, kind: input, shape index: {}]   ;;  %s1804_s9 = inlined_call_operand.vmem [shape: f32[2], index: 9, kind: input, shape index: {}]   ;;  %s1805_s10 = inlined_call_operand.vmem [shape: f32[2], index: 10, kind: input, shape index: {}]   ;;  %s1806_s11 = inlined_call_operand.vmem [shape: s32[2], index: 11, kind: input, shape index: {}]   ;;  %s1807_s12 = inlined_call_operand.vmem [shape: s32[2,3,8], index: 12, kind: output, shape index: {}]  }
   0x1   :  { %1812 = sst [smem:[#allocation11_spill]] %s1799_s4 }
   0x2   :  { %1813 = sst [smem:[#allocation12_spill]] %s1805_s10 }
   0x3   :  { %17 = vsyncpa [#allocation4], 0 }
   0x4   :  { %18 = vsyncpa [#allocation6], 0  ;;  %s1505_s21 = smov 0   ;;  %s1507_s22 = smov 0  }
   0x5   :  { %s1509_s23 = smov 0   ;;  %s1511_s24 = smov 0  }
   0x6   :  { %s1513_s25 = smov 0  }
   0x7 LB: > { %1814 = sst [smem:[#allocation10_spill]] %s1413_s23  ;;  %s1815_s10 = sld [smem:[#allocation12_spill]]  ;;  %s1421_s25 = sphi %s1513_s25, %s24_s25   ;;  %s1417_s24 = sphi %s1511_s24, %s1826_s24   ;;  %s1413_s23 = sphi %s1509_s23, %s1825_s23   ;;  %s1409_s22 = sphi %s1507_s22, %s1824_s22   ;;  %s1405_s21 = sphi %s1505_s21, %s1823_s21  }
   0x8   : > { %s1038_s29 = sadd.s32 4294967295, %s1421_s25   ;;  %p1040_p0 = scmp.ge.s32.totalorder %s1421_s25, 1 }
   0x9   : > { %p326_p1 = scmp.lt.s32.totalorder %s1421_s25, 7  ;;  %p1536_p2 = scmp.eq.s32.totalorder %s1038_s29, 0 }
   0xa   : > { %s33_s15 = sadd.s32 1, %s1413_s23 }
   0xb   : > { %s1816_s30 = scalar_select %p1536_p2, 1, 0 }
   0xc   : > { %p1540_p3 = pnand %p1040_p0, %p326_p1  ;;  %p1553_p6 = scmp.ge.s32.totalorder %s33_s15, 3 }
   0xd   : > { %s374_s28 = sshll.u32 %s1815_s10, 4  ;;  %s375_s28 = int_to_ptr.vmem [resolvable:$true] %s374_s28 }
   0xe   : > { %s1817_s13 = scalar_select %p1540_p3, 1, 0 }
   0xf   : > { %p1220_p4 = pneg %p1540_p3  ;;  %s1330_s17 = scalar_lea.vmem %s375_s28, 16 }
  0x10   : > { %p1331_p7 = scmp.ne.s32.totalorder %s375_s28, %s1330_s17  ;;  %p1338_p11 = scmp.lt.s32.totalorder %s375_s28, %s375_s28 }
  0x11   : > { %p1548_p5 = pnand %p1536_p2, %p1220_p4  ;;  %p1339_p12 = scmp.lt.s32.totalorder %s1330_s17, %s1330_s17 }
  0x13   : > { %p1332_p8 = pneg %p1548_p5  ;;  %p1340_p13 = por %p1339_p12, %p1338_p11 }
  0x15   : > { %p1333_p9 = pnand %p1332_p8, %p1331_p7 }
  0x17   : > { %p1334_p10 = pneg %p1333_p9 }
  0x19   : > { %p1341_p0 = pnand %p1340_p13, %p1334_p10 }
  0x1b   : > { %1344 = shalt.err (!%p1341_p0)
}
  0x1c   : > { %s1423_s18 = smov [#allocation5]   ;;  %s1828_s15 = smov (%p1553_p6, %s33_s15), 0 }
  0x1d   : > { %1226 = dma.vmem_to_smem (!%p1548_p5), %s375_s28, 16, %s1423_s18, [#allocation6]  }
  0x1e   : > { %s36_s19 = sadd.s32 1, %s1417_s24  ;;  %s363_s27 = sshll.u32 %s1804_s9, 4  ;;  %s364_s27 = int_to_ptr.vmem [resolvable:$true] %s363_s27 }
  0x1f   : > { %s1830_s19 = smov (!%p1553_p6, %s36_s19), %s1417_s24  ;;  %s385_s10 = sshll.u32 %s1806_s11, 4  ;;  %s386_s10 = int_to_ptr.vmem [resolvable:$true] %s385_s10 }
  0x20   : > { %p38_p1 = scmp.ge.s32.totalorder %s1830_s19, 2  ;;  %s1345_s23 = scalar_lea.vmem %s364_s27, 16 }
  0x21   : > { %p1346_p4 = scmp.ne.s32.totalorder %s364_s27, %s1345_s23  ;;  %p1353_p10 = scmp.lt.s32.totalorder %s364_s27, %s364_s27 }
  0x22   : > { %p1354_p11 = scmp.lt.s32.totalorder %s1345_s23, %s1345_s23 }
  0x23   : > { %p1348_p7 = pnand %p1346_p4, %p1332_p8 }
  0x24   : > { %p1355_p12 = por %p1354_p11, %p1353_p10 }
  0x25   : > { %p1349_p9 = pneg %p1348_p7 }
  0x27   : > { %p1356_p13 = pnand %p1355_p12, %p1349_p9 }
  0x29   : > { %1359 = shalt.err (!%p1356_p13)
}
  0x2a   : > { %s1424_s28 = smov [#allocation3]   ;;  %s1832_s19 = smov (%p38_p1, %s1830_s19), 0 }
  0x2b   : > { %1223 = dma.vmem_to_smem (!%p1548_p5), %s364_s27, 16, %s1424_s28, [#allocation4]  }
  0x2c   : > { %s1360_s16 = scalar_lea.vmem %s386_s10, 16  ;;  %p1368_p7 = scmp.lt.s32.totalorder %s386_s10, %s386_s10 }
  0x2d   : > { %p1361_p6 = scmp.ne.s32.totalorder %s386_s10, %s1360_s16  ;;  %p1369_p2 = scmp.lt.s32.totalorder %s1360_s16, %s1360_s16 }
  0x2f   : > { %p1363_p0 = pnand %p1361_p6, %p1332_p8  ;;  %p1370_p3 = por %p1369_p2, %p1368_p7 }
  0x31   : > { %p1364_p4 = pneg %p1363_p0 }
  0x33   : > { %p1371_p10 = pnand %p1370_p3, %p1364_p4 }
  0x35   : > { %1374 = shalt.err (!%p1371_p10)
}
  0x36   : > { %s1425_s23 = smov [#allocation7]   ;;  %p1820_p9 = scmp.ne.s32.totalorder %s1817_s13, 0 }
  0x37   : > { %1229 = dma.vmem_to_smem (!%p1548_p5), %s386_s10, 16, %s1425_s23, [#allocation6]  }
  0x38   : > { %408 = sbr.rel (%p1820_p9) target bundleno = 893 (0x37d), region = 68  ;;  %p1821_p1 = scmp.ne.s32.totalorder (!%p1820_p9), %s1816_s30, 0 }
  0x3f   : > { %1396 = dma.done.wait (%p1821_p1), [#allocation4], 16  }
  0x40   : > { %1398 = vsyncadd (%p1821_p1), [#allocation4], 4294967280 }
  0x41   : > { %1400 = dma.done.wait (%p1821_p1), [#allocation6], 32  }
  0x42   : > { %1402 = vsyncadd (%p1821_p1), [#allocation6], 4294967264 }
  0x43   : > { %422 = sfence }
  0x44   : > { %s1822_s4 = sld [smem:[#allocation11_spill]]  ;;  %v1426_v1 = vmov 0   ;;  %v1608_v2 = vld [vmem:[%s1798_s3] sm:$0xff]  ;;  %p460_p2 = scmp.lt.s32.totalorder %s1409_s22, 1  ;;  %v513_v4 = vld [vmem:[%s1798_s3 + $0x8] sm:$0xff]  ;;  %v474_v5 = vlaneseq  ;;  %v1427_v7 = vmov 1  }
  0x45   : > { %1294 = vset.pattern.permute.xlu1 %v1426_v1  ;;  %1293 = vset.pattern.permute.xlu0 %v1426_v1  ;;  %p462_p3 = scmp.lt.s32.totalorder %s1405_s21, 2  ;;  %s1614_s30 = sld [smem:[#allocation3 + %s1409_s22]]  ;;  %v1428_v12 = vmov 2   ;;  %v1429_v18 = vmov 3   ;;  %v488_v20 = vld [vmem:[%s1796_s1] sm:$0x1] }
  0x46   : > { %520 = vperm.xlu0 %1293, %v1608_v2   ;;  %s1617_s14 = sld [smem:[#allocation5 + %s1409_s22]]  ;;  %p493_p5 = scmp.gt.s32.totalorder %s1405_s21, 0  ;;  %v1641_v8 = vand.u32 127, %v474_v5  ;;  %v490_v21 = vld [vmem:[%s1797_s2] sm:$0x1]  ;;  %v529_v22 = vshrl.u32 %v474_v5, 7 }
  0x47   : > { %s461_s29 = scalar_select %p460_p2, %s1409_s22, 1  ;;  %v1430_v28 = vmov 4   ;;  %vm1436_vm8 = vmmov 0   ;;  %vm653_vm13 = vcmask 654336  }
  0x48   : > { %s463_s17 = scalar_select %p462_p3, %s1405_s21, 2  ;;  %vm494_vm1 = vcmp.lt.s32.totalorder %v1641_v8, 32  ;;  %v530_v26 = vsub.s32 0, %v529_v22  ;;  %vm516_vm4 = vcmp.ge.s32.totalorder %v1641_v8, 2  ;;  %vm538_vm5 = vcmp.ge.s32.totalorder %v1641_v8, 1 }
  0x49   : > { %s1207_s23 = smul.u32 3, %s461_s29  ;;  %s1049_s18 = sshll.u32 %s461_s29, 2  ;;  %vm574_vm6 = vcmp.lt.s32.totalorder %v1641_v8, 127  ;;  %vm594_vm7 = vcmp.lt.s32.totalorder %v1641_v8, 126  ;;  %vm1162_vm9 = vmpackc.low %vm516_vm4, %vm516_vm4 }
  0x4a   : > { %v500_v0 = vld [vmem:[%s1822_s4] sm:$0xff]  ;;  %v501_v3 = vld [vmem:[%s1822_s4 + $0x8] sm:$0xff]  ;;  %525 = vperm.xlu0 %1293, %v513_v4   ;;  %s1630_s13 = scalar_lea.vmem %s1807_s12, %s1049_s18  ;;  %s473_s27 = sld [smem:[#allocation7 + %s1409_s22]]  ;;  %vm1166_vm10 = vmpackc.low %vm538_vm5, %vm538_vm5 }
  0x4b   : > { %504 = vperm.xlu1 %1294, %v500_v0   ;;  %s465_s26 = sadd.s32 %s1207_s23, %s463_s17  ;;  %s1050_s4 = sshll.u32 %s1405_s21, 7  ;;  %v482_v11 = vstv %s1614_s30  ;;  %vm1173_vm11 = vmpackc.low %vm574_vm6, %vm574_vm6 }
  0x4c   : > { %v484_v6 = vstv %s1617_s14  ;;  %s466_s29 = scalar_lea.vmem %s1795_s0, %s465_s26  ;;  %v478_v9 = vstv %s1050_s4  ;;  %s1431_s20 = smov 2   ;;  %vm1177_vm12 = vmpackc.low %vm594_vm7, %vm594_vm7 }
  0x4d   : > { %1324 = vrcp.f32 %v484_v6  ;;  %v476_v10 = vld [vmem:[%s466_s29] sm:$0x1]  ;;  %s495_s22 = scalar_select %p493_p5, 1, 0  ;;  %v479_v13 = vadd.s32 %v478_v9, %v1641_v8 }
  0x4e   : > { %1295 = vset.pattern.permute.xlu0 %v1427_v7  ;;  %v483_v15 = vsub.f32 %v476_v10, %v482_v11  ;;  %s1432_s10 = smov 1   ;;  %s1433_s26 = smov 127   ;;  %v1435_v10 = vmov 0.0|0.0  }
  0x4f   : > { %509 = vperm.xlu1 %1294, %v501_v3   ;;  %541 = vperm.xlu0 %1295, %v1608_v2   ;;  %v496_v16 = vstv %s495_s22  ;;  %p1060_p8 = scmp.ne.s32.totalorder %s1405_s21, 0 }
  0x50   : > { %v480_v14 = vstv %s473_s27  ;;  %vm497_vm2 = vcmp.eq.s32.totalorder %v496_v16, 1  ;;  %s1434_s27 = smov 126   ;;  %1160 = vmatprep.subr.bf16.mxu0 %v1435_v10  ;;  %vm733_vm14 = vcmask (!%p1060_p8), 125952  }
  0x51   : > { %vm481_vm0 = vcmp.lt.s32.totalorder %v479_v13, %v480_v14  ;;  %vm498_vm3 = vmand %vm497_vm2, %vm494_vm1 }
  0x53   : > { %1296 = vset.pattern.permute.xlu1 %v1427_v7  ;;  %1297 = vset.pattern.permute.xlu0 %v1428_v12 }
  0x54   : > { %545 = vperm.xlu1 %1296, %v513_v4   ;;  %557 = vperm.xlu0 %1297, %v1608_v2  }
  0x57   : > { %v1325_v17 = vpop.eup %1324 }
  0x58   : > { %1298 = vset.pattern.permute.xlu1 %v1428_v12  ;;  %v486_v19 = vmul.f32 %v1325_v17, %v483_v15  ;;  %1299 = vset.pattern.permute.xlu0 %v1429_v18 }
  0x59   : > { %561 = vperm.xlu1 %1298, %v513_v4   ;;  %577 = vperm.xlu0 %1299, %v1608_v2  }
  0x5a   : > { %v487_v23 = vsel %vm481_vm0, %v486_v19, 0.0 }
  0x5b   : > { %v489_v24 = vmul.f32 %v488_v20, %v487_v23  ;;  %v491_v25 = vmul.f32 %v490_v21, %v487_v23  ;;  %v1437_v20 = vmov 0.0   ;;  %v647_v21 = vld [vmem:[%s1801_s6] sm:$0xf] }
  0x5c   : > { %1115 = vmatprep.mubr.msk.f32.mxu0 %vm1436_vm8, %v1437_v20 }
  0x5d   : > { %1300 = vset.pattern.permute.xlu1 %v1429_v18  ;;  %v492_v27 = vadd.f32 %v491_v25, %v489_v24  ;;  %1302 = vset.pattern.permute.xlu0 %v1430_v28 }
  0x5e   : > { %581 = vperm.xlu1 %1300, %v513_v4   ;;  %601 = vperm.xlu0 %1302, %v513_v4  }
  0x5f   : > { %v499_v29 = vsel %vm498_vm3, %v492_v27, %v487_v23 }
  0x60   : > { %v567_v30 = vrot.slane %v499_v29, %v530_v26 }
  0x62   : > { %1301 = vset.pattern.permute.xlu1 %v1430_v28  ;;  %1323 = vset.pattern.permute.xlu0 %v1426_v1 }
  0x63   : > { %514 = vrot.lane.b32.xlu1 %v499_v29, %s1431_s20 }
  0x67   : > { %536 = vrot.lane.b32.xlu1 %v499_v29, %s1432_s10 }
  0x6b   : > { %597 = vperm.xlu1 %1301, %v1608_v2  }
  0x6f   : > { %572 = vrot.lane.b32.xlu1 %v499_v29, %s1433_s26 }
  0x73   : > { %592 = vrot.lane.b32.xlu1 %v499_v29, %s1434_s27 }
  0xc5   : > { %v521_v34 = vpop.permute.xlu0 %520 }
  0xc9   : > { %v526_v36 = vpop.permute.xlu0 %525 }
  0xca   : > { %v505_v31 = vpop.permute.xlu1 %504 }
  0xce   : > { %v510_v32 = vpop.permute.xlu1 %509  ;;  %v542_v38 = vpop.permute.xlu0 %541 }
  0xd3   : > { %v546_v33 = vpop.permute.xlu1 %545  ;;  %v558_v45 = vpop.permute.xlu0 %557 }
  0xd4   : > { %v568_v48 = vmul.f32 %v567_v30, %v558_v45 }
  0xd8   : > { %v562_v35 = vpop.permute.xlu1 %561  ;;  %v578_v59 = vpop.permute.xlu0 %577 }
  0xd9   : > { %v569_v53 = vmul.f32 %v567_v30, %v562_v35 }
  0xdd   : > { %v582_v37 = vpop.permute.xlu1 %581  ;;  %v602_v4 = vpop.permute.xlu0 %601 }
  0xe1   : > { %v515_v39 = vpop.permute.xlu1 %514 }
  0xe2   : > { %v517_v40 = vsel %vm516_vm4, %v515_v39, 0.0 }
  0xe3   : > { %v531_v41 = vrot.slane %v517_v40, %v530_v26 }
  0xe5   : > { %v532_v42 = vmul.f32 %v531_v41, %v521_v34  ;;  %v533_v43 = vmul.f32 %v531_v41, %v526_v36  ;;  %v537_v44 = vpop.permute.xlu1 %536 }
  0xe6   : > { %v539_v46 = vsel %vm538_vm5, %v537_v44, 0.0  ;;  %v1438_v44 = vmov (!%p1060_p8), 0.0  }
  0xe7   : > { %v551_v47 = vrot.slane %v539_v46, %v530_v26  ;;  %v535_v49 = vadd.f32 %v533_v43, %v510_v32  ;;  %v534_v51 = vadd.f32 %v532_v42, %v505_v31  ;;  %734 = vst.msk [vmem:[#allocation2] sm:$0xf] (!%p1060_p8), %vm733_vm14, %v1438_v44 }
  0xe9   : > { %v553_v50 = vmul.f32 %v551_v47, %v546_v33  ;;  %v552_v52 = vmul.f32 %v551_v47, %v542_v38  ;;  %v646_v38 = vld [vmem:[%s1800_s5] sm:$0xf] }
  0xea   : > { %v598_v56 = vpop.permute.xlu1 %597 }
  0xeb   : > { %v555_v54 = vadd.f32 %v553_v50, %v535_v49  ;;  %v554_v55 = vadd.f32 %v552_v52, %v534_v51 }
  0xed   : > { %v570_v57 = vadd.f32 %v568_v48, %v554_v55  ;;  %v571_v58 = vadd.f32 %v569_v53, %v555_v54 }
  0xee   : > { %v573_v60 = vpop.permute.xlu1 %572 }
  0xef   : > { %v575_v61 = vsel %vm574_vm6, %v573_v60, 0.0 }
  0xf0   : > { %v587_v62 = vrot.slane %v575_v61, %v530_v26 }
  0xf2   : > { %v589_v63 = vmul.f32 %v587_v62, %v582_v37  ;;  %v588_v0 = vmul.f32 %v587_v62, %v578_v59  ;;  %v593_v2 = vpop.permute.xlu1 %592 }
  0xf3   : > { %v595_v3 = vsel %vm594_vm7, %v593_v2, 0.0 }
  0xf4   : > { %v590_v5 = vadd.f32 %v588_v0, %v570_v57  ;;  %v607_v7 = vrot.slane %v595_v3, %v530_v26  ;;  %v591_v9 = vadd.f32 %v589_v63, %v571_v58 }
  0xf6   : > { %v608_v12 = vmul.f32 %v607_v7, %v598_v56  ;;  %v609_v13 = vmul.f32 %v607_v7, %v602_v4 }
  0xf8   : > { %v610_v14 = vadd.f32 %v608_v12, %v590_v5  ;;  %v611_v15 = vadd.f32 %v609_v13, %v591_v9 }
  0xfa   : > { %v612_v16 = vmax.f32 %v610_v14, 0.0  ;;  %v613_v17 = vmax.f32 %v611_v15, 0.0 }
  0xfc   : > { %v1308_v18 = vpack.i.bf16 %v613_v17, %v612_v16  ;;  %v1169_v19 = vpack.c.bf16 %v613_v17, %v612_v16 }
  0xfe   : > { %1309 = vrot.lane.b32.xlu1 %v1308_v18, %s1432_s10  ;;  %1304 = vrot.lane.b32.xlu0 %v1308_v18, %s1431_s20 }
 0x102   : > { %1319 = vrot.lane.b32.xlu1 %v1308_v18, %s1434_s27  ;;  %1314 = vrot.lane.b32.xlu0 %v1308_v18, %s1433_s26 }
 0x106   : > { %650 = vperm.xlu0 %1323, %v647_v21  }
 0x170   : > { %v1310_v22 = vpop.permute.xlu1 %1309  ;;  %v1305_v23 = vpop.permute.xlu0 %1304 }
 0x171   : > { %v1307_v24 = vunpack.i.h.bf16 %v1305_v23  ;;  %v1306_v25 = vunpack.i.l.bf16 %v1305_v23  ;;  %v1312_v26 = vunpack.i.h.bf16 %v1310_v22  ;;  %v1311_v27 = vunpack.i.l.bf16 %v1310_v22 }
 0x173   : > { %v1161_v28 = vpack.c.bf16 %v1307_v24, %v1306_v25  ;;  %v1165_v29 = vpack.c.bf16 %v1312_v26, %v1311_v27 }
 0x174   : > { %v1315_v30 = vpop.permute.xlu0 %1314  ;;  %v1320_v33 = vpop.permute.xlu1 %1319 }
 0x175   : > { %1163 = vmatpush3.bf16.msk.msra.mxu0 %vm1162_vm9, %v1161_v28  ;;  %v1317_v31 = vunpack.i.h.bf16 %v1315_v30  ;;  %v1316_v32 = vunpack.i.l.bf16 %v1315_v30  ;;  %v1322_v34 = vunpack.i.h.bf16 %v1320_v33  ;;  %v1321_v35 = vunpack.i.l.bf16 %v1320_v33 }
 0x176   : > { %1164 = vmatprep.subr.bf16.mxu0 %v1435_v10 }
 0x177   : > { %v1172_v36 = vpack.c.bf16 %v1317_v31, %v1316_v32  ;;  %v1176_v37 = vpack.c.bf16 %v1322_v34, %v1321_v35 }
 0x179   : > { %1167 = vmatpush3.bf16.msk.msra.mxu0 %vm1166_vm10, %v1165_v29 }
 0x17a   : > { %1168 = vmatprep.subr.bf16.mxu0 %v1435_v10 }
 0x17d   : > { %1170 = vmatpush3.bf16.msra.mxu0 %v1169_v19 }
 0x17e   : > { %1171 = vmatprep.subr.bf16.mxu0 %v1435_v10 }
 0x181   : > { %1174 = vmatpush3.bf16.msk.msra.mxu0 %vm1173_vm11, %v1172_v36 }
 0x182   : > { %1175 = vmatprep.subr.bf16.mxu0 %v1435_v10 }
 0x185   : > { %1178 = vmatpush3.bf16.msk.msra.mxu0 %vm1177_vm12, %v1176_v37  ;;  %v651_v39 = vpop.permute.xlu0 %650 }
 0x188   : > { %1116 = vmatmul.mubr.msk.f32.vlgmr.msra.gmra.mrb[0].mxu0 %vm653_vm13, %v646_v38 }
 0x25a   : > { %732 = sbr.rel (%p1060_p8) target bundleno = 609 (0x261), region = 84 }
 0x25b   : > { %v723_v40 = vpop.f32.mrb[0].mxu0 }
 0x25c   : > { %v724_v41 = vadd.f32 %v723_v40, %v651_v39  ;;  %v1117_v42 = vpop.f32.mrb[1].mxu0 }
 0x25e   : > { %v727_v43 = vmul.f32 %v724_v41, %v484_v6 }
 0x260   : > { %v728_v8 = vadd.f32 %v727_v43, %v482_v11 }
 0x261 PF: > { %1179 = vmatprep.subr.bf16.mxu1 %v1435_v10  ;;  %v746_v45 = vld [vmem:[%s1803_s8] sm:$0xff]  ;;  %v747_v46 = vld [vmem:[%s1803_s8 + $0x8] sm:$0xff]  ;;  %v748_v6 = vld [vmem:[%s1803_s8 + $0x10] sm:$0xff]  ;;  %1203 = vmatprep.subr.bf16.mxu0 %v1435_v10  ;;  %s1439_s26 = smov 16   ;;  %vm832_vm15 = vcmask 130048   ;;  %vm740_vm0 = vcmask 125952   ;;  %s935_s27 = scalar_lea.vmem %s1630_s13, %s1405_s21 }
 0x262   : > { %v1180_v11 = vpack.c.bf16 %v747_v46, %v746_v45  ;;  %v749_v47 = vld [vmem:[%s1803_s8 + $0x18] sm:$0xff]  ;;  %1157 = vmatprep.mubr.msk.f32.mxu0 %vm1436_vm8, %v1437_v20  ;;  %1150 = vmatprep.mubr.msk.f32.mxu1 %vm1436_vm8, %v1437_v20  ;;  %v750_v49 = vld [vmem:[%s1803_s8 + $0x20] sm:$0xff]  ;;  %v751_v50 = vld [vmem:[%s1803_s8 + $0x28] sm:$0xff]  ;;  %v745_v13 = vmul.f32 %v728_v8, %v728_v8  ;;  %vm936_vm7 = vcmask 57344  }
 0x263   : > { %737 = vrot.lane.b32.xlu0 %v728_v8, %s1439_s26  ;;  %v1183_v48 = vpack.c.bf16 %v749_v47, %v748_v6  ;;  %v743_v51 = vld [vmem:[%s1802_s7] sm:$0xff]  ;;  %v744_v52 = vld [vmem:[%s1802_s7 + $0x8] sm:$0xff]  ;;  %v1186_v55 = vpack.c.bf16 %v751_v50, %v750_v49  ;;  %v752_v57 = vld [vmem:[%s1803_s8 + $0x30] sm:$0xff] }
 0x264   : > { %1181 = vmatpush3.bf16.msra.mxu1 %v1180_v11  ;;  %v1204_v53 = vpack.c.bf16 %v744_v52, %v743_v51  ;;  %v735_v54 = vld [vmem:[#allocation2] sm:$0xf]  ;;  %v753_v58 = vld [vmem:[%s1803_s8 + $0x38] sm:$0xff]  ;;  %v755_v61 = vld [vmem:[%s1803_s8 + $0x48] sm:$0xff] }
 0x265   : > { %1182 = vmatprep.subr.bf16.mxu1 %v1435_v10  ;;  %v742_v56 = vmul.f32 %v735_v54, %v735_v54  ;;  %v1189_v59 = vpack.c.bf16 %v753_v58, %v752_v57  ;;  %v754_v60 = vld [vmem:[%s1803_s8 + $0x40] sm:$0xff]  ;;  %v756_v63 = vld [vmem:[%s1803_s8 + $0x50] sm:$0xff]  ;;  %v757_v0 = vld [vmem:[%s1803_s8 + $0x58] sm:$0xff] }
 0x266   : > { %1205 = vmatpush3.bf16.msra.mxu0 %v1204_v53  ;;  %v1192_v62 = vpack.c.bf16 %v755_v61, %v754_v60  ;;  %v1195_v2 = vpack.c.bf16 %v757_v0, %v756_v63  ;;  %v758_v3 = vld [vmem:[%s1803_s8 + $0x60] sm:$0xff]  ;;  %v759_v4 = vld [vmem:[%s1803_s8 + $0x68] sm:$0xff]  ;;  %v760_v7 = vld [vmem:[%s1803_s8 + $0x70] sm:$0xff] }
 0x267   : > { %v1198_v5 = vpack.c.bf16 %v759_v4, %v758_v3  ;;  %v761_v9 = vld [vmem:[%s1803_s8 + $0x78] sm:$0xff] }
 0x268   : > { %1184 = vmatpush3.bf16.msra.mxu1 %v1183_v48  ;;  %v1201_v12 = vpack.c.bf16 %v761_v9, %v760_v7 }
 0x269   : > { %1185 = vmatprep.subr.bf16.mxu1 %v1435_v10  ;;  %1158 = vmatmul.mubr.msk.f32.vlgmr.msra.gmra.mrb[2].mxu0 %vm832_vm15, %v742_v56 }
 0x26c   : > { %1187 = vmatpush3.bf16.msra.mxu1 %v1186_v55 }
 0x26d   : > { %1188 = vmatprep.subr.bf16.mxu1 %v1435_v10 }
 0x270   : > { %1190 = vmatpush3.bf16.msra.mxu1 %v1189_v59 }
 0x271   : > { %1191 = vmatprep.subr.bf16.mxu1 %v1435_v10 }
 0x274   : > { %1193 = vmatpush3.bf16.msra.mxu1 %v1192_v62 }
 0x275   : > { %1194 = vmatprep.subr.bf16.mxu1 %v1435_v10 }
 0x278   : > { %1196 = vmatpush3.bf16.msra.mxu1 %v1195_v2 }
 0x279   : > { %1197 = vmatprep.subr.bf16.mxu1 %v1435_v10 }
 0x27c   : > { %1199 = vmatpush3.bf16.msra.mxu1 %v1198_v5 }
 0x27d   : > { %1200 = vmatprep.subr.bf16.mxu1 %v1435_v10 }
 0x280   : > { %1202 = vmatpush3.bf16.msra.mxu1 %v1201_v12 }
 0x283   : > { %1151 = vmatmul.mubr.f32.vlgmr.msra.gmra.mrb[0].mxu1 %v745_v13 }
 0x2d5   : > { %v738_v14 = vpop.permute.xlu0 %737 }
 0x2d6   : > { %741 = vst.msk [vmem:[#allocation2] sm:$0xf] %vm740_vm0, %v738_v14 }
 0x33c   : > { %v902_v15 = vpop.f32.mrb[2].mxu0 }
 0x33d   : > { %v1159_v16 = vpop.f32.mrb[3].mxu0 }
 0x356   : > { %v828_v17 = vpop.f32.mrb[0].mxu1 }
 0x357   : > { %v903_v18 = vadd.f32 %v902_v15, %v828_v17  ;;  %v1152_v19 = vpop.f32.mrb[1].mxu1 }
 0x359   : > { %v906_v20 = vmul.f32 0.03125, %v903_v18 }
 0x35b   : > { %v908_v21 = vrot.slane %v906_v20, 1  ;;  %v911_v23 = vrot.slane %v906_v20, 2  ;;  %v914_v25 = vrot.slane %v906_v20, 3 }
 0x35d   : > { %v910_v22 = vadd.f32 %v908_v21, %v906_v20 }
 0x35f   : > { %v913_v24 = vadd.f32 %v911_v23, %v910_v22 }
 0x361   : > { %v916_v26 = vadd.f32 %v914_v25, %v913_v24 }
 0x363   : > { %vm917_vm1 = vcmp.lt.f32.partialorder %v916_v26, 1e-07 }
 0x364   : > { %v918_v10 = vsel %vm917_vm1, 1.0, %v916_v26 }
 0x365   : > { %1326 = vrcp.f32 %v918_v10  ;;  %v924_v27 = vrot.slane %v918_v10, 5 }
 0x367   : > { %1328 = vrcp.f32 %v924_v27 }
 0x36f   : > { %v1327_v28 = vpop.eup %1326 }
 0x370   : > { %v920_v30 = vmul.f32 %v1327_v28, %v913_v24 }
 0x371   : > { %v1329_v29 = vpop.eup %1328 }
 0x372   : > { %v927_v31 = vmul.f32 %v1329_v29, %v906_v20  ;;  %vm921_vm3 = vcmp.le.f32.partialorder %v920_v30, 0.01 }
 0x373   : > { %vm922_vm4 = vmor %vm917_vm1, %vm921_vm3 }
 0x374   : > { %vm928_vm2 = vcmp.ge.f32.partialorder %v927_v31, 0.99 }
 0x375   : > { %v929_v32 = vsel %vm928_vm2, 1, %v1426_v1 }
 0x376   : > { %v930_v33 = vrot.slane %v929_v32, 3 }
 0x378   : > { %vm931_vm5 = vcmp.ne.s32.totalorder %v930_v33, 0 }
 0x379   : > { %vm932_vm6 = vmor %vm917_vm1, %vm931_vm5 }
 0x37a   : > { %vm933_vm8 = vmand %vm922_vm4, %vm932_vm6 }
 0x37b   : > { %v934_v34 = vsel %vm933_vm8, 1, %v1426_v1 }
 0x37c   : > { %937 = vst.msk [vmem:[%s935_s27] sm:$0x1] %vm936_vm7, %v934_v34 }
 0x37d PF: > { %s24_s25 = sadd.s32 1, %s1421_s25   ;;  %s1823_s21 = sld [smem:[#allocation10_spill]] }
 0x37e   : > { %p21_p11 = scmp.ge.s32.totalorder %s24_s25, 8   ;;  %s1824_s22 = smov %s1417_s24 }
 0x37f   : > { %s1825_s23 = smov %s1828_s15  ;;  %s1826_s24 = smov %s1832_s19 }
 0x380   :  { %23 = sbr.rel (!%p21_p11) target bundleno = 7 (0x7), region = 116 }
 0x387   :  { %957 = vsyncpa [#allocation4], 1 }
 0x388   :  { %959 = vsyncpa [#allocation4 + $0x1], 1 }
 0x389   :  { %960 = vsyncpa [#allocation6], 1 }

</bundles_post_ra>
